<compile_context>
chip_gen: v6e
topology: v6e:2x2x1
jax: 0.10.0
libtpu: 0.0.40
codegen_flags: <defaults>
</compile_context>

<pallas_src>
import jax
import jax.numpy as jnp
from jax.experimental import pallas as pl
from jax.experimental.pallas import tpu as pltpu


def _make_copies(embed_hbm, tokens_hbm, out_hbm, sems, b, slot):
    """Build the two DMA descriptors for batch element `b` on sem slot `slot`."""
    n_tok = embed_hbm.shape[0]
    s = tokens_hbm.shape[1]
    # Learned prompt -> out[b, 0:n_tok, :]   (broadcast over batch)
    prompt_cp = pltpu.make_async_copy(
        embed_hbm, out_hbm.at[b, pl.ds(0, n_tok), :], sems.at[slot, 0])
    # tokens[b] -> out[b, n_tok:n_tok+S, :]  (contiguous destination rows)
    tokens_cp = pltpu.make_async_copy(
        tokens_hbm.at[b], out_hbm.at[b, pl.ds(n_tok, s), :], sems.at[slot, 1])
    return prompt_cp, tokens_cp


def _soft_prompt_kernel(embed_hbm, tokens_hbm, out_hbm, sems):
    b = pl.program_id(0)
    nb = pl.num_programs(0)
    slot = b % 2

    # Kick off this batch element's copies first (destinations are disjoint
    # across steps, so overlapping with the previous step's copies is safe).
    prompt_cp, tokens_cp = _make_copies(embed_hbm, tokens_hbm, out_hbm, sems, b, slot)
    prompt_cp.start()
    tokens_cp.start()

    # Wait for the copies issued on the previous grid step (2-deep pipeline).
    # A wait only needs a matching shape + semaphore, so we rebuild descriptors
    # at the current batch index but with the previous slot's semaphores.
    @pl.when(b > 0)
    def _():
        prev_prompt, prev_tokens = _make_copies(
            embed_hbm, tokens_hbm, out_hbm, sems, b, 1 - slot)
        prev_prompt.wait()
        prev_tokens.wait()

    # Drain this step's copies on the final grid step.
    @pl.when(b == nb - 1)
    def _():
        last_prompt, last_tokens = _make_copies(
            embed_hbm, tokens_hbm, out_hbm, sems, b, slot)
        last_prompt.wait()
        last_tokens.wait()


def soft_prompt_forward(learned_embed: jax.Array, tokens: jax.Array) -> jax.Array:
    """Pallas equivalent of SoftPrompt.forward(tokens)."""
    n_tokens, d = learned_embed.shape
    b, s, d2 = tokens.shape
    assert d == d2, "embedding dims must match"

    # DMAs are bit-copies: match the parameter dtype to the activation dtype up
    # front (handles e.g. f32 prompt params with bf16 token activations).
    learned_embed = learned_embed.astype(tokens.dtype)

    return pl.pallas_call(
        _soft_prompt_kernel,
        out_shape=jax.ShapeDtypeStruct((b, n_tokens + s, d), tokens.dtype),
        grid_spec=pltpu.PrefetchScalarGridSpec(
            num_scalar_prefetch=0,
            grid=(b,),
            in_specs=[
                pl.BlockSpec(memory_space=pl.ANY),   # learned prompt stays in HBM
                pl.BlockSpec(memory_space=pl.ANY),   # tokens stay in HBM
            ],
            out_specs=pl.BlockSpec(memory_space=pl.ANY),  # written directly via DMA
            scratch_shapes=[pltpu.SemaphoreType.DMA((2, 2))],  # [slot, {prompt,tokens}]
        ),
        # Cross-step DMA pipelining assumes sequential grid execution.
        compiler_params=pltpu.CompilerParams(
            dimension_semantics=("arbitrary",),
        ),
    )(learned_embed, tokens)


if __name__ == "__main__":
    # Small, deterministic setup consistent with the module's __init__.
    n_tokens = 8          # sublane-aligned prompt length (f32 tile = 8 rows)
    n_embd = 128          # lane-dense hidden size (multiple of 128)
    random_range = 0.5
    batch = 2
    seq = 8

    key = jax.random.PRNGKey(0)
    k_embed, k_tokens = jax.random.split(key)

    # uniform(-r, r), matching torch.FloatTensor(n_tokens, n_embd).uniform_(-r, r).
    learned_embed = jax.random.uniform(
        k_embed, (n_tokens, n_embd), dtype=jnp.float32,
        minval=-random_range, maxval=random_range)
    tokens = jax.random.normal(k_tokens, (batch, seq, n_embd), dtype=jnp.float32)

    out = soft_prompt_forward(learned_embed, tokens)
    out = jax.block_until_ready(out)

    # Reference check (pure JAX) of the concat semantics.
    ref = jnp.concatenate(
        [jnp.broadcast_to(learned_embed[None], (batch, n_tokens, n_embd)), tokens],
        axis=1)
    assert out.shape == (batch, n_tokens + seq, n_embd)
    assert jnp.allclose(out, ref), "mismatch vs reference"

    print("KERNEL_OK")
</pallas_src>

<mosaic_0001>
module attributes {stable_mosaic.version = 11 : i64} {
  func.func @_soft_prompt_kernel(%arg0: i32, %arg1: memref<8x128xf32, #tpu.memory_space<any>>, %arg2: memref<2x8x128xf32, #tpu.memory_space<any>>, %arg3: memref<2x16x128xf32, #tpu.memory_space<any>>, %arg4: memref<2x2x!tpu.dma_semaphore, #tpu.memory_space<semaphore_mem>>) attributes {dimension_semantics = [#tpu.dimension_semantics<arbitrary>], iteration_bounds = array<i64: 2>, scalar_prefetch = 0 : i64, scratch_operands = 1 : i64, tpu.core_type = #tpu.core_type<tc>, window_params = [{}, {}, {}]} {
    %c2_i32 = arith.constant 2 : i32
    %c0_i32 = arith.constant 0 : i32
    %0 = arith.cmpi eq, %c2_i32, %c0_i32 : i32
    %c1_i32 = arith.constant 1 : i32
    %1 = arith.select %0, %c1_i32, %c2_i32 : i32
    %2 = arith.remsi %arg0, %1 : i32
    %c0_i32_0 = arith.constant 0 : i32
    %3 = arith.cmpi ne, %2, %c0_i32_0 : i32
    %c0_i32_1 = arith.constant 0 : i32
    %4 = arith.cmpi slt, %2, %c0_i32_1 : i32
    %c0_i32_2 = arith.constant 0 : i32
    %5 = arith.cmpi slt, %1, %c0_i32_2 : i32
    %6 = arith.xori %4, %5 : i1
    %7 = arith.andi %6, %3 : i1
    %8 = arith.addi %2, %1 : i32
    %9 = arith.select %7, %8, %2 : i32
    %c0_i32_3 = arith.constant 0 : i32
    %c0_i32_4 = arith.constant 0 : i32
    %c0_i32_5 = arith.constant 0 : i32
    %10 = tpu.memref_slice %arg3[%arg0, %c0_i32_4, %c0_i32_5] : memref<2x16x128xf32, #tpu.memory_space<any>> -> memref<1x8x128xf32, #tpu.memory_space<any>>
    %11 = tpu.memref_squeeze %10 : memref<1x8x128xf32, #tpu.memory_space<any>> -> memref<8x128xf32, #tpu.memory_space<any>>
    %12 = tpu.memref_slice %arg4[%9, %c0_i32_3] : memref<2x2x!tpu.dma_semaphore, #tpu.memory_space<semaphore_mem>> -> memref<1x1x!tpu.dma_semaphore, #tpu.memory_space<semaphore_mem>>
    %13 = tpu.memref_squeeze %12 : memref<1x1x!tpu.dma_semaphore, #tpu.memory_space<semaphore_mem>> -> memref<!tpu.dma_semaphore, #tpu.memory_space<semaphore_mem>>
    tpu.enqueue_dma source(%arg1 : memref<8x128xf32, #tpu.memory_space<any>>) target(%11 : memref<8x128xf32, #tpu.memory_space<any>>) target_semaphore(%13 : memref<!tpu.dma_semaphore, #tpu.memory_space<semaphore_mem>>)
    %c1_i32_6 = arith.constant 1 : i32
    %c0_i32_7 = arith.constant 0 : i32
    %c0_i32_8 = arith.constant 0 : i32
    %14 = tpu.memref_slice %arg2[%arg0, %c0_i32_7, %c0_i32_8] : memref<2x8x128xf32, #tpu.memory_space<any>> -> memref<1x8x128xf32, #tpu.memory_space<any>>
    %15 = tpu.memref_squeeze %14 : memref<1x8x128xf32, #tpu.memory_space<any>> -> memref<8x128xf32, #tpu.memory_space<any>>
    %c8_i32 = arith.constant 8 : i32
    %c0_i32_9 = arith.constant 0 : i32
    %16 = tpu.memref_slice %arg3[%arg0, %c8_i32, %c0_i32_9] : memref<2x16x128xf32, #tpu.memory_space<any>> -> memref<1x8x128xf32, #tpu.memory_space<any>>
    %17 = tpu.memref_squeeze %16 : memref<1x8x128xf32, #tpu.memory_space<any>> -> memref<8x128xf32, #tpu.memory_space<any>>
    %18 = tpu.memref_slice %arg4[%9, %c1_i32_6] : memref<2x2x!tpu.dma_semaphore, #tpu.memory_space<semaphore_mem>> -> memref<1x1x!tpu.dma_semaphore, #tpu.memory_space<semaphore_mem>>
    %19 = tpu.memref_squeeze %18 : memref<1x1x!tpu.dma_semaphore, #tpu.memory_space<semaphore_mem>> -> memref<!tpu.dma_semaphore, #tpu.memory_space<semaphore_mem>>
    tpu.enqueue_dma source(%15 : memref<8x128xf32, #tpu.memory_space<any>>) target(%17 : memref<8x128xf32, #tpu.memory_space<any>>) target_semaphore(%19 : memref<!tpu.dma_semaphore, #tpu.memory_space<semaphore_mem>>)
    %c0_i32_10 = arith.constant 0 : i32
    %20 = arith.cmpi sgt, %arg0, %c0_i32_10 : i32
    %21 = arith.extui %20 : i1 to i32
    %c0_i32_11 = arith.constant 0 : i32
    %22 = arith.cmpi ne, %21, %c0_i32_11 : i32
    scf.if %22 {
      %c1_i32_14 = arith.constant 1 : i32
      %26 = arith.subi %c1_i32_14, %9 : i32
      %c0_i32_15 = arith.constant 0 : i32
      %c0_i32_16 = arith.constant 0 : i32
      %c0_i32_17 = arith.constant 0 : i32
      %27 = tpu.memref_slice %arg3[%arg0, %c0_i32_16, %c0_i32_17] : memref<2x16x128xf32, #tpu.memory_space<any>> -> memref<1x8x128xf32, #tpu.memory_space<any>>
      %28 = tpu.memref_squeeze %27 : memref<1x8x128xf32, #tpu.memory_space<any>> -> memref<8x128xf32, #tpu.memory_space<any>>
      %29 = tpu.memref_slice %arg4[%26, %c0_i32_15] : memref<2x2x!tpu.dma_semaphore, #tpu.memory_space<semaphore_mem>> -> memref<1x1x!tpu.dma_semaphore, #tpu.memory_space<semaphore_mem>>
      %30 = tpu.memref_squeeze %29 : memref<1x1x!tpu.dma_semaphore, #tpu.memory_space<semaphore_mem>> -> memref<!tpu.dma_semaphore, #tpu.memory_space<semaphore_mem>>
      tpu.wait_dma2 semaphore(%30 : memref<!tpu.dma_semaphore, #tpu.memory_space<semaphore_mem>>) src(%arg1 : memref<8x128xf32, #tpu.memory_space<any>>) dst(%28 : memref<8x128xf32, #tpu.memory_space<any>>)
      %c1_i32_18 = arith.constant 1 : i32
      %c0_i32_19 = arith.constant 0 : i32
      %c0_i32_20 = arith.constant 0 : i32
      %31 = tpu.memref_slice %arg2[%arg0, %c0_i32_19, %c0_i32_20] : memref<2x8x128xf32, #tpu.memory_space<any>> -> memref<1x8x128xf32, #tpu.memory_space<any>>
      %32 = tpu.memref_squeeze %31 : memref<1x8x128xf32, #tpu.memory_space<any>> -> memref<8x128xf32, #tpu.memory_space<any>>
      %c8_i32_21 = arith.constant 8 : i32
      %c0_i32_22 = arith.constant 0 : i32
      %33 = tpu.memref_slice %arg3[%arg0, %c8_i32_21, %c0_i32_22] : memref<2x16x128xf32, #tpu.memory_space<any>> -> memref<1x8x128xf32, #tpu.memory_space<any>>
      %34 = tpu.memref_squeeze %33 : memref<1x8x128xf32, #tpu.memory_space<any>> -> memref<8x128xf32, #tpu.memory_space<any>>
      %35 = tpu.memref_slice %arg4[%26, %c1_i32_18] : memref<2x2x!tpu.dma_semaphore, #tpu.memory_space<semaphore_mem>> -> memref<1x1x!tpu.dma_semaphore, #tpu.memory_space<semaphore_mem>>
      %36 = tpu.memref_squeeze %35 : memref<1x1x!tpu.dma_semaphore, #tpu.memory_space<semaphore_mem>> -> memref<!tpu.dma_semaphore, #tpu.memory_space<semaphore_mem>>
      tpu.wait_dma2 semaphore(%36 : memref<!tpu.dma_semaphore, #tpu.memory_space<semaphore_mem>>) src(%32 : memref<8x128xf32, #tpu.memory_space<any>>) dst(%34 : memref<8x128xf32, #tpu.memory_space<any>>)
    } else {
    }
    %c1_i32_12 = arith.constant 1 : i32
    %23 = arith.cmpi eq, %arg0, %c1_i32_12 : i32
    %24 = arith.extui %23 : i1 to i32
    %c0_i32_13 = arith.constant 0 : i32
    %25 = arith.cmpi ne, %24, %c0_i32_13 : i32
    scf.if %25 {
      %c0_i32_14 = arith.constant 0 : i32
      %c0_i32_15 = arith.constant 0 : i32
      %c0_i32_16 = arith.constant 0 : i32
      %26 = tpu.memref_slice %arg3[%arg0, %c0_i32_15, %c0_i32_16] : memref<2x16x128xf32, #tpu.memory_space<any>> -> memref<1x8x128xf32, #tpu.memory_space<any>>
      %27 = tpu.memref_squeeze %26 : memref<1x8x128xf32, #tpu.memory_space<any>> -> memref<8x128xf32, #tpu.memory_space<any>>
      %28 = tpu.memref_slice %arg4[%9, %c0_i32_14] : memref<2x2x!tpu.dma_semaphore, #tpu.memory_space<semaphore_mem>> -> memref<1x1x!tpu.dma_semaphore, #tpu.memory_space<semaphore_mem>>
      %29 = tpu.memref_squeeze %28 : memref<1x1x!tpu.dma_semaphore, #tpu.memory_space<semaphore_mem>> -> memref<!tpu.dma_semaphore, #tpu.memory_space<semaphore_mem>>
      tpu.wait_dma2 semaphore(%29 : memref<!tpu.dma_semaphore, #tpu.memory_space<semaphore_mem>>) src(%arg1 : memref<8x128xf32, #tpu.memory_space<any>>) dst(%27 : memref<8x128xf32, #tpu.memory_space<any>>)
      %c1_i32_17 = arith.constant 1 : i32
      %c0_i32_18 = arith.constant 0 : i32
      %c0_i32_19 = arith.constant 0 : i32
      %30 = tpu.memref_slice %arg2[%arg0, %c0_i32_18, %c0_i32_19] : memref<2x8x128xf32, #tpu.memory_space<any>> -> memref<1x8x128xf32, #tpu.memory_space<any>>
      %31 = tpu.memref_squeeze %30 : memref<1x8x128xf32, #tpu.memory_space<any>> -> memref<8x128xf32, #tpu.memory_space<any>>
      %c8_i32_20 = arith.constant 8 : i32
      %c0_i32_21 = arith.constant 0 : i32
      %32 = tpu.memref_slice %arg3[%arg0, %c8_i32_20, %c0_i32_21] : memref<2x16x128xf32, #tpu.memory_space<any>> -> memref<1x8x128xf32, #tpu.memory_space<any>>
      %33 = tpu.memref_squeeze %32 : memref<1x8x128xf32, #tpu.memory_space<any>> -> memref<8x128xf32, #tpu.memory_space<any>>
      %34 = tpu.memref_slice %arg4[%9, %c1_i32_17] : memref<2x2x!tpu.dma_semaphore, #tpu.memory_space<semaphore_mem>> -> memref<1x1x!tpu.dma_semaphore, #tpu.memory_space<semaphore_mem>>
      %35 = tpu.memref_squeeze %34 : memref<1x1x!tpu.dma_semaphore, #tpu.memory_space<semaphore_mem>> -> memref<!tpu.dma_semaphore, #tpu.memory_space<semaphore_mem>>
      tpu.wait_dma2 semaphore(%35 : memref<!tpu.dma_semaphore, #tpu.memory_space<semaphore_mem>>) src(%31 : memref<8x128xf32, #tpu.memory_space<any>>) dst(%33 : memref<8x128xf32, #tpu.memory_space<any>>)
    } else {
    }
    return
  }
}

</mosaic_0001>

<bundles_post_ra>
// kernel: tpu_custom_call.1
= control target key start
LH: loop header
LB: loop body
LE: loop exit
PB: predicated region body
PF: predicated region fallthrough
CT: control target
= control target key end

     0   :  { %s207_s9 = smov 0   ;;  %s239_s0 = inlined_call_operand.hbm [shape: f32[8,128], index: 0, kind: input, shape index: {}]   ;;  %s240_s1 = inlined_call_operand.hbm [shape: f32[2,8,128], index: 1, kind: input, shape index: {}]   ;;  %s241_s2 = inlined_call_operand.hbm [shape: f32[2,16,128], index: 2, kind: output, shape index: {}]  }
   0x1 LB: > { %p14_p0 = scmp.lt.s32.totalorder %s188_s9, 0  ;;  %s15_s10 = ssub.s32 0, %s188_s9  ;;  %s188_s9 = sphi %s207_s9, %s12_s9  }
   0x2   : > { %s126_s11 = smin.u32 %s188_s9, %s15_s10  ;;  %s145_s12 = sshll.u32 %s188_s9, 8 }
   0x3   : > { %s17_s13 = sand.u32 1, %s126_s11   ;;  %s28_s17 = scalar_lea.hbm %s241_s2, %s145_s12 }
   0x4   : > { %s18_s14 = ssub.s32 0, %s17_s13  ;;  %p154_p1 = scmp.gt.s32.totalorder %s188_s9, 0 }
   0x5   : > { %s243_s14 = smov (!%p14_p0, %s18_s14), %s17_s13  ;;  %s146_s19 = sshll.u32 %s188_s9, 7 }
   0x6   : > { %p128_p2 = scmp.lt.s32.totalorder %s243_s14, 0  ;;  %s24_s18 = sadd.s32 2, %s243_s14 }
   0x7   : > { %s112_s20 = scalar_lea.hbm %s28_s17, 128  ;;  %s40_s23 = scalar_lea.hbm %s240_s1, %s146_s19 }
   0x8   : > { %s245_s18 = smov (!%p128_p2, %s24_s18), %s243_s14  ;;  %s190_s28 = smov 131072  }
   0x9   : > { %s131_s24 = sshll.u32 %s245_s18, 1  ;;  %s57_s25 = ssub.s32 1, %s245_s18 }
   0xa   : > { %s138_s26 = sshll.u32 %s57_s25, 1  ;;  %s30_s27 = scalar_lea.sflag [#allocation2], %s131_s24 }
   0xb   : > { %s191_s29 = smov 0   ;;  %s115_s4 = scalar_lea.sflag %s30_s27, 1 [#allocation2] }
   0xc   : > { %37 = dma.general %s239_s0, 128, %s28_s17, %s30_s27, %s190_s28, [#allocation4], %s191_s29, 0  }
   0xd   : > { %52 = dma.general %s40_s23, 128, %s112_s20, %s115_s4, %s190_s28, [#allocation6], %s191_s29, 0  }
   0xe   : > { %s59_s5 = scalar_lea.sflag [#allocation2], %s138_s26 }
   0xf   : > { %171 = dma.done.wait (%p154_p1), %s59_s5, 128 }
  0x10   : > { %173 = vsyncadd (%p154_p1), %s59_s5, 4294967168  ;;  %s120_s6 = scalar_lea.sflag %s59_s5, 1 [#allocation2] }
  0x11   : > { %175 = dma.done.wait (%p154_p1), %s120_s6, 128 }
  0x12   : > { %177 = vsyncadd (%p154_p1), %s120_s6, 4294967168  ;;  %p155_p3 = scmp.eq.s32.totalorder %s188_s9, 1 }
  0x14   : > { %179 = dma.done.wait (%p155_p3), %s30_s27, 128 }
  0x15   : > { %181 = vsyncadd (%p155_p3), %s30_s27, 4294967168 }
  0x16   : > { %183 = dma.done.wait (%p155_p3), %s115_s4, 128 }
  0x17   : > { %185 = vsyncadd (%p155_p3), %s115_s4, 4294967168  ;;  %s12_s9 = sadd.s32 1, %s188_s9  }
  0x18   : > { %p9_p4 = scmp.ge.s32.totalorder %s12_s9, 2  }
  0x1a   :  { %11 = sbr.rel (!%p9_p4) target bundleno = 1 (0x1), region = 37 }
  0x1f   :  { %76 = vsyncmov [#allocation2] }
  0x22   :  { %s77_s7 = vpop.sfrf %76 }
  0x23   :  { %p141_p5 = scmp.ne.s32.totalorder %s77_s7, 0 }
  0x25   :  { %81 = shalt.err (%p141_p5)  }
  0x26   :  { %83 = vsyncmov [#allocation2 + $0x1] }
  0x29   :  { %s84_s8 = vpop.sfrf %83 }
  0x2a   :  { %p142_p6 = scmp.ne.s32.totalorder %s84_s8, 0 }
  0x2c   :  { %88 = shalt.err (%p142_p6)  }
  0x2d   :  { %90 = vsyncmov [#allocation2 + $0x2] }
  0x30   :  { %s91_s10 = vpop.sfrf %90 }
  0x31   :  { %p143_p7 = scmp.ne.s32.totalorder %s91_s10, 0 }
  0x33   :  { %95 = shalt.err (%p143_p7)  }
  0x34   :  { %97 = vsyncmov [#allocation2 + $0x3] }
  0x37   :  { %s98_s11 = vpop.sfrf %97 }
  0x38   :  { %p144_p8 = scmp.ne.s32.totalorder %s98_s11, 0 }
  0x3a   :  { %102 = shalt.err (%p144_p8)  }

</bundles_post_ra>
